<compile_context>
chip_gen: v7x
topology: tpu7x:2x2x1
jax: 0.10.0
libtpu: 0.0.40
codegen_flags: <defaults>
</compile_context>

<pallas_src>
import math

import jax
import jax.numpy as jnp
from jax.experimental import pallas as pl
from jax.experimental.pallas import tpu as pltpu


def _attention_kernel(x_ref, wa_ref, ba_ref, v_ref, ctx_ref, attn_ref):
    """One grid step = `tb` batch rows, full sequence + feature dims.

    x_ref   : [tb, S, D]  features (f32)
    wa_ref  : [D, H]      attention weight, pre-transposed, bf16
    ba_ref  : [1, H]      attention bias, f32
    v_ref   : [1, H]      context-vector weight (PyTorch [1, H] layout), f32
    ctx_ref : [tb, D]     output context vectors
    attn_ref: [tb, S]     output attention weights (softmax over S)
    """
    tb, S, D = x_ref.shape
    H = wa_ref.shape[1]

    x = x_ref[...]                                              # [tb, S, D] f32

    # ---- scores = tanh(x @ Wa + ba) . v ------------------------------------
    # bf16 MXU operands, f32 accumulation; f32 element-wise epilogue.
    h = jnp.dot(
        x.reshape(tb * S, D).astype(jnp.bfloat16),
        wa_ref[...],
        preferred_element_type=jnp.float32,
    )                                                           # [tb*S, H] f32
    h = jnp.tanh(h + ba_ref[...])                               # f32
    s = jnp.sum(h.reshape(tb, S, H) * v_ref[...], axis=-1)      # [tb, S] f32

    # ---- softmax over the sequence (lane) axis, f32 ------------------------
    m = jnp.max(s, axis=-1, keepdims=True)
    e = jnp.exp(s - m)
    w = e / jnp.sum(e, axis=-1, keepdims=True)                  # [tb, S]

    # ---- context = sum_s w[b, s] * x[b, s, :] ------------------------------
    ctx = jnp.sum(x * w[:, :, None], axis=1)                    # [tb, D] f32

    ctx_ref[...] = ctx.astype(ctx_ref.dtype)
    attn_ref[...] = w.astype(attn_ref.dtype)


def attention_mechanism(features, wa, ba, v, *, tile_b=None):
    """features: [B, S, D] f32; wa: [D, H] (nn.Linear weight pre-transposed);
    ba: [H]; v: [1, H] (context_vector.weight, PyTorch layout).

    Returns (context_vector [B, D], attention_weights [B, S]).
    """
    B, S, D = features.shape
    H = wa.shape[1]

    # --- batch tile selection (VMEM-budget driven, not a hardcoded tiny tile).
    if tile_b is None:
        if B <= 8:
            tile_b = B                      # block == full batch at toy sizes
        else:
            # ~2 MiB of f32 features per block (pipeline double-buffers it),
            # rounded to a multiple of 8 so output sublane tiling stays legal.
            budget = max(8, (2 * 1024 * 1024) // (S * D * 4))
            tile_b = max(8, (min(budget, B) // 8) * 8)

    # --- no hard divisibility assert: cdiv grid + zero-pad the batch tail.
    grid_b = pl.cdiv(B, tile_b)
    Bp = grid_b * tile_b
    if Bp != B:
        features = jnp.pad(features, ((0, Bp - B), (0, 0), (0, 0)))

    # Weights: bf16 into the MXU; bias / context vector stay f32 (f32 epilogue).
    wa_bf16 = wa.astype(jnp.bfloat16)
    ba_2d = ba.reshape(1, H).astype(jnp.float32)
    v_2d = v.reshape(1, H).astype(jnp.float32)

    cost = pl.CostEstimate(
        flops=2 * Bp * S * D * H + 2 * Bp * S * H + 2 * Bp * S * D,
        transcendentals=Bp * S * H + Bp * S,          # tanh + exp
        bytes_accessed=(Bp * S * D * 4 + D * H * 2 + 2 * H * 4
                        + Bp * D * 4 + Bp * S * 4),
    )

    ctx, attn = pl.pallas_call(
        _attention_kernel,
        out_shape=(
            jax.ShapeDtypeStruct((Bp, D), features.dtype),
            jax.ShapeDtypeStruct((Bp, S), features.dtype),
        ),
        grid_spec=pltpu.PrefetchScalarGridSpec(
            num_scalar_prefetch=0,
            grid=(grid_b,),
            in_specs=[
                pl.BlockSpec((tile_b, S, D), lambda i: (i, 0, 0)),  # features tile
                pl.BlockSpec((D, H), lambda i: (0, 0)),             # Wa (resident)
                pl.BlockSpec((1, H), lambda i: (0, 0)),             # ba (resident)
                pl.BlockSpec((1, H), lambda i: (0, 0)),             # v  (resident)
            ],
            out_specs=[
                pl.BlockSpec((tile_b, D), lambda i: (i, 0)),        # context
                pl.BlockSpec((tile_b, S), lambda i: (i, 0)),        # attn weights
            ],
        ),
        compiler_params=pltpu.CompilerParams(
            dimension_semantics=("parallel",)),   # batch tiles -> both TCs on v7x
        cost_estimate=cost,
    )(features, wa_bf16, ba_2d, v_2d)

    return ctx[:B], attn[:B]


def _reference(features, wa, ba, v):
    # Mirrors the kernel's precision policy: bf16 operands into the score
    # matmul, f32 accumulation and f32 element-wise everywhere else.
    xb = features.astype(jnp.bfloat16).astype(jnp.float32)
    wab = wa.astype(jnp.bfloat16).astype(jnp.float32)
    h = jnp.tanh(xb @ wab + ba)                     # [B, S, H]
    s = jnp.sum(h * v, axis=-1)                     # [B, S]
    w = jax.nn.softmax(s, axis=1)                   # softmax over sequence
    ctx = jnp.sum(features * w[:, :, None], axis=1) # [B, D]
    return ctx, w


if __name__ == "__main__":
    # Small config consistent with the module: batch=2, seq=8, input_dim=32, hidden_dim=64
    B, S, D, H = 2, 8, 32, 64

    key = jax.random.PRNGKey(0)
    kx, k1, k2, k3 = jax.random.split(key, 4)

    features = jax.random.normal(kx, (B, S, D), dtype=jnp.float32)

    # Deterministic parameter init (uniform like nn.Linear's default range)
    lim_a = 1.0 / math.sqrt(D)
    lim_v = 1.0 / math.sqrt(H)
    wa = jax.random.uniform(k1, (D, H), minval=-lim_a, maxval=lim_a, dtype=jnp.float32)
    ba = jax.random.uniform(k2, (H,), minval=-lim_a, maxval=lim_a, dtype=jnp.float32)
    v = jax.random.uniform(k3, (1, H), minval=-lim_v, maxval=lim_v, dtype=jnp.float32)

    ctx, attn = attention_mechanism(features, wa, ba, v)
    ctx = jax.block_until_ready(ctx)
    attn = jax.block_until_ready(attn)

    ref_ctx, ref_attn = _reference(features, wa, ba, v)

    assert ctx.shape == (B, D)
    assert attn.shape == (B, S)
    assert jnp.allclose(attn, ref_attn, atol=1e-4, rtol=1e-4)
    assert jnp.allclose(ctx, ref_ctx, atol=1e-4, rtol=1e-4)

    print("KERNEL_OK")
</pallas_src>

<mosaic_0001>
module attributes {stable_mosaic.version = 11 : i64} {
  func.func @_attention_kernel(%arg0: i32, %arg1: memref<2x8x32xf32, #tpu.memory_space<vmem>>, %arg2: memref<32x64xbf16, #tpu.memory_space<vmem>>, %arg3: memref<1x64xf32, #tpu.memory_space<vmem>>, %arg4: memref<1x64xf32, #tpu.memory_space<vmem>>, %arg5: memref<2x32xf32, #tpu.memory_space<vmem>>, %arg6: memref<2x8xf32, #tpu.memory_space<vmem>>) attributes {dimension_semantics = [#tpu.dimension_semantics<parallel>], iteration_bounds = array<i64: 1>, scalar_prefetch = 0 : i64, scratch_operands = 0 : i64, tpu.core_type = #tpu.core_type<tc>, window_params = [{transform_indices = @transform_0, window_bounds = array<i64: 2, 8, 32>}, {pipeline_mode = #tpu.pipeline_mode<synchronous>, transform_indices = @transform_1, window_bounds = array<i64: 32, 64>}, {pipeline_mode = #tpu.pipeline_mode<synchronous>, transform_indices = @transform_2, window_bounds = array<i64: 1, 64>}, {pipeline_mode = #tpu.pipeline_mode<synchronous>, transform_indices = @transform_3, window_bounds = array<i64: 1, 64>}, {transform_indices = @transform_4, window_bounds = array<i64: 2, 32>}, {transform_indices = @transform_5, window_bounds = array<i64: 2, 8>}]} {
    %c0 = arith.constant 0 : index
    %c0_0 = arith.constant 0 : index
    %c0_1 = arith.constant 0 : index
    %0 = vector.load %arg1[%c0, %c0_0, %c0_1] : memref<2x8x32xf32, #tpu.memory_space<vmem>>, vector<2x8x32xf32>
    %1 = vector.shape_cast %0 : vector<2x8x32xf32> to vector<16x32xf32>
    %2 = arith.truncf %1 : vector<16x32xf32> to vector<16x32xbf16>
    %c0_2 = arith.constant 0 : index
    %c0_3 = arith.constant 0 : index
    %3 = vector.load %arg2[%c0_2, %c0_3] : memref<32x64xbf16, #tpu.memory_space<vmem>>, vector<32x64xbf16>
    %cst = arith.constant dense<0.000000e+00> : vector<16x64xf32>
    %4 = tpu.matmul %2, %3, %cst {dimension_numbers = #tpu.dot_dimension_numbers<[1], [0], [0], [1], [0, 0, 1, 1], [], []>} : vector<16x32xbf16>, vector<32x64xbf16>, vector<16x64xf32> -> vector<16x64xf32>
    %c0_4 = arith.constant 0 : index
    %c0_5 = arith.constant 0 : index
    %5 = vector.load %arg3[%c0_4, %c0_5] : memref<1x64xf32, #tpu.memory_space<vmem>>, vector<1x64xf32>
    %6 = vector.broadcast %5 : vector<1x64xf32> to vector<16x64xf32>
    %7 = arith.addf %4, %6 : vector<16x64xf32>
    %8 = math.tanh %7 : vector<16x64xf32>
    %9 = vector.shape_cast %8 : vector<16x64xf32> to vector<2x8x64xf32>
    %c0_6 = arith.constant 0 : index
    %c0_7 = arith.constant 0 : index
    %10 = vector.load %arg4[%c0_6, %c0_7] : memref<1x64xf32, #tpu.memory_space<vmem>>, vector<1x64xf32>
    %11 = vector.shape_cast %10 : vector<1x64xf32> to vector<1x1x64xf32>
    %12 = vector.broadcast %11 : vector<1x1x64xf32> to vector<2x8x64xf32>
    %13 = arith.mulf %9, %12 : vector<2x8x64xf32>
    %cst_8 = arith.constant dense<0.000000e+00> : vector<2x8xf32>
    %14 = vector.multi_reduction <add>, %13, %cst_8 [2] : vector<2x8x64xf32> to vector<2x8xf32>
    %cst_9 = arith.constant dense<0xFF800000> : vector<2xf32>
    %15 = vector.multi_reduction <maximumf>, %14, %cst_9 [1] : vector<2x8xf32> to vector<2xf32>
    %16 = vector.shape_cast %15 : vector<2xf32> to vector<2x1xf32>
    %17 = vector.broadcast %16 : vector<2x1xf32> to vector<2x8xf32>
    %18 = arith.subf %14, %17 : vector<2x8xf32>
    %19 = math.exp %18 : vector<2x8xf32>
    %cst_10 = arith.constant dense<0.000000e+00> : vector<2xf32>
    %20 = vector.multi_reduction <add>, %19, %cst_10 [1] : vector<2x8xf32> to vector<2xf32>
    %21 = vector.shape_cast %20 : vector<2xf32> to vector<2x1xf32>
    %22 = vector.broadcast %21 : vector<2x1xf32> to vector<2x8xf32>
    %23 = arith.divf %19, %22 : vector<2x8xf32>
    %24 = vector.shape_cast %23 : vector<2x8xf32> to vector<2x8x1xf32>
    %25 = vector.broadcast %24 : vector<2x8x1xf32> to vector<2x8x32xf32>
    %26 = arith.mulf %0, %25 : vector<2x8x32xf32>
    %cst_11 = arith.constant dense<0.000000e+00> : vector<2x32xf32>
    %27 = vector.multi_reduction <add>, %26, %cst_11 [1] : vector<2x8x32xf32> to vector<2x32xf32>
    %c0_12 = arith.constant 0 : index
    %c0_13 = arith.constant 0 : index
    %28 = vector.load %arg5[%c0_12, %c0_13] : memref<2x32xf32, #tpu.memory_space<vmem>>, vector<2x32xf32>
    tpu.vector_store %arg5[%c0_12, %c0_13], %27 {strides = array<i32>} : memref<2x32xf32, #tpu.memory_space<vmem>>, vector<2x32xf32>,
    %c0_14 = arith.constant 0 : index
    %c0_15 = arith.constant 0 : index
    %29 = vector.load %arg6[%c0_14, %c0_15] : memref<2x8xf32, #tpu.memory_space<vmem>>, vector<2x8xf32>
    tpu.vector_store %arg6[%c0_14, %c0_15], %23 {strides = array<i32>} : memref<2x8xf32, #tpu.memory_space<vmem>>, vector<2x8xf32>,
    return
  }
  func.func @transform_0(%arg0: i32) -> (i32, i32, i32) {
    %c0_i32 = arith.constant 0 : i32
    %c0_i32_0 = arith.constant 0 : i32
    %c0_i32_1 = arith.constant 0 : i32
    return %arg0, %c0_i32, %c0_i32_0 : i32, i32, i32
  }
  func.func @transform_1(%arg0: i32) -> (i32, i32) {
    %c0_i32 = arith.constant 0 : i32
    %c0_i32_0 = arith.constant 0 : i32
    %c0_i32_1 = arith.constant 0 : i32
    return %c0_i32, %c0_i32_0 : i32, i32
  }
  func.func @transform_2(%arg0: i32) -> (i32, i32) {
    %c0_i32 = arith.constant 0 : i32
    %c0_i32_0 = arith.constant 0 : i32
    %c0_i32_1 = arith.constant 0 : i32
    return %c0_i32, %c0_i32_0 : i32, i32
  }
  func.func @transform_3(%arg0: i32) -> (i32, i32) {
    %c0_i32 = arith.constant 0 : i32
    %c0_i32_0 = arith.constant 0 : i32
    %c0_i32_1 = arith.constant 0 : i32
    return %c0_i32, %c0_i32_0 : i32, i32
  }
  func.func @transform_4(%arg0: i32) -> (i32, i32) {
    %c0_i32 = arith.constant 0 : i32
    %c0_i32_0 = arith.constant 0 : i32
    return %arg0, %c0_i32 : i32, i32
  }
  func.func @transform_5(%arg0: i32) -> (i32, i32) {
    %c0_i32 = arith.constant 0 : i32
    %c0_i32_0 = arith.constant 0 : i32
    return %arg0, %c0_i32 : i32, i32
  }
}

</mosaic_0001>

<bundles_post_ra>
// kernel: tpu_custom_call.1
= control target key start
LH: loop header
LB: loop body
LE: loop exit
PB: predicated region body
PF: predicated region fallthrough
CT: control target
= control target key end

     0   :  { %11 = vsyncpa [#allocation3], 0  ;;  %s536_s0 = inlined_call_operand.hbm [shape: f32[2,8,32], index: 0, kind: input, shape index: {}]   ;;  %s537_s1 = inlined_call_operand.hbm [shape: bf16[32,64], index: 1, kind: input, shape index: {}]   ;;  %s538_s2 = inlined_call_operand.vmem [shape: f32[1,64], index: 2, kind: input, shape index: {}]   ;;  %s539_s3 = inlined_call_operand.vmem [shape: f32[1,64], index: 3, kind: input, shape index: {}]   ;;  %s540_s4 = inlined_call_operand.hbm [shape: f32[2,32], index: 4, kind: output, shape index: {0}]   ;;  %s541_s5 = inlined_call_operand.hbm [shape: f32[2,8], index: 5, kind: output, shape index: {1}]  }
   0x1   :  { %12 = vsyncpa [#allocation6], 0 }
   0x2   :  { %13 = vsyncpa [#allocation4], 0 }
   0x3   :  { %14 = vsyncpa [#allocation9], 0  ;;  %s423_s18 = smov [#allocation2]   ;;  %s327_s22 = scalar_lea.hbm %s536_s0, 256 }
   0x4   :  { %s20_s19 = sshll.u32 %s423_s18, 4  ;;  %p328_p0 = scmp.ne.s32.totalorder %s536_s0, %s327_s22  ;;  %s21_s19 = int_to_ptr.vmem [resolvable:$true] %s20_s19 }
   0x5   :  { %p331_p1 = scmp.lt.u32.totalorder %s327_s22, %s536_s0 }
   0x7   :  { %p333_p2 = pnand %p331_p1, %p328_p0 }
   0x9   :  { %336 = shalt.err (!%p333_p2)
}
   0xa   :  { %s337_s27 = scalar_lea.vmem %s21_s19, 256  ;;  %p342_p4 = scmp.lt.s32.totalorder %s21_s19, %s21_s19 }
   0xb   :  { %p338_p3 = scmp.ne.s32.totalorder %s21_s19, %s337_s27  ;;  %p343_p5 = scmp.lt.s32.totalorder %s337_s27, %s337_s27 }
   0xd   :  { %p344_p6 = por %p343_p5, %p342_p4 }
   0xf   :  { %p345_p7 = pnand %p344_p6, %p338_p3 }
  0x11   :  { %348 = shalt.err (!%p345_p7)
}
  0x12   :  { %s424_s28 = smov 128   ;;  %s425_s29 = smov 8  }
  0x13   :  { %26 = dma.hbm_to_vmem [thread:$0]  %s536_s0, 256, %s21_s19, [#allocation3], %s424_s28, %s424_s28, %s425_s29  }
  0x14   :  { %s426_s7 = smov [#allocation5]   ;;  %s349_s11 = scalar_lea.hbm %s537_s1, 256 }
  0x15   :  { %s32_s8 = sshll.u32 %s426_s7, 4  ;;  %p350_p8 = scmp.ne.s32.totalorder %s537_s1, %s349_s11  ;;  %s33_s8 = int_to_ptr.vmem [resolvable:$true] %s32_s8 }
  0x16   :  { %p353_p9 = scmp.lt.u32.totalorder %s349_s11, %s537_s1 }
  0x18   :  { %p355_p10 = pnand %p353_p9, %p350_p8 }
  0x1a   :  { %358 = shalt.err (!%p355_p10)
}
  0x1b   :  { %s359_s16 = scalar_lea.vmem %s33_s8, 256  ;;  %p364_p12 = scmp.lt.s32.totalorder %s33_s8, %s33_s8 }
  0x1c   :  { %p360_p11 = scmp.ne.s32.totalorder %s33_s8, %s359_s16  ;;  %p365_p13 = scmp.lt.s32.totalorder %s359_s16, %s359_s16 }
  0x1e   :  { %p366_p0 = por %p365_p13, %p364_p12 }
  0x20   :  { %p367_p1 = pnand %p366_p0, %p360_p11 }
  0x22   :  { %370 = shalt.err (!%p367_p1)
}
  0x23   :  { %s427_s0 = smov 64   ;;  %s428_s17 = smov 4  }
  0x24   :  { %38 = dma.hbm_to_vmem [thread:$0]  %s537_s1, 256, %s33_s8, [#allocation6], %s427_s0, %s427_s0, %s428_s17  }
  0x25   :  { %415 = dma.done.wait [#allocation3], 256  }
  0x26   :  { %416 = vsyncadd [#allocation3], 4294967040 }
  0x27   :  { %417 = dma.done.wait [#allocation6], 256  }
  0x28   :  { %418 = vsyncadd [#allocation6], 4294967040  ;;  %v429_v0 = vmov 0.0   ;;  %vm430_vm0 = vmmov 0   ;;  %v313_v1 = vld [vmem:[#allocation5] sm:$0xff]   ;;  %v314_v2 = vld [vmem:[#allocation5 + $0x8] sm:$0xff]   ;;  %v141_v20 = vlaneseq }
  0x29   :  { %292 = vmatprep.subr.bf16.mxu0 %v429_v0  ;;  %296 = vmatprep.mubr.msk.bf16.mxu0 %vm430_vm0, %v429_v0  ;;  %v488_v3 = vld [vmem:[#allocation2] sm:$0xff]  ;;  %v490_v4 = vld [vmem:[#allocation2 + $0x8] sm:$0xff]  ;;  %vm76_vm1 = vcmask 261120   ;;  %vm132_vm2 = vcmask 523264   ;;  %vm151_vm3 = vcmask 1041409   ;;  %vm154_vm4 = vcmask 58368  }
  0x2a   :  { %293 = vmatpush3.bf16.msra.mxu0 %v313_v1  ;;  %v52_v5 = vpack.c.bf16 %v490_v4, %v488_v3  ;;  %v284_v6 = vld [vmem:[%s538_s2] ss:$0 sm:$0xff]  ;;  %v142_v21 = vand.u32 127, %v141_v20  ;;  %v144_v22 = vshrl.u32 %v141_v20, 7  ;;  %v431_v30 = vmov 0   ;;  %s432_s2 = smov [#allocation8]  }
  0x2b   :  { %294 = vmatprep.subr.bf16.mxu0 %v429_v0  ;;  %v288_v13 = vld [vmem:[%s539_s3] ss:$0 sm:$0xff]  ;;  %312 = vset.pattern.permute.xlu0 %v431_v30  ;;  %s270_s3 = sshll.u32 %s432_s2, 4  ;;  %s271_s3 = int_to_ptr.vmem [resolvable:$true] %s270_s3 }
  0x2c   :  { %v145_v24 = vsub.s32 %v142_v21, %v144_v22  ;;  %311 = vset.pattern.permute.xlu1 %v431_v30  ;;  %v161_v31 = vsub.s32 0, %v144_v22  ;;  %v165_v32 = vsub.s32 1, %v144_v22  ;;  %s371_s23 = scalar_lea.vmem %s271_s3, 32  ;;  %p376_p3 = scmp.lt.s32.totalorder %s271_s3, %s271_s3 }
  0x2d   :  { %p372_p2 = scmp.ne.s32.totalorder %s271_s3, %s371_s23  ;;  %p377_p4 = scmp.lt.s32.totalorder %s371_s23, %s371_s23 }
  0x2e   :  { %295 = vmatpush3.bf16.msra.mxu0 %v314_v2 }
  0x2f   :  { %p378_p5 = por %p377_p4, %p376_p3 }
  0x31   :  { %297 = vmatmul.mubr.msk.bf16.vlgmr.msra.gmra.mrb[0].mxu0 %vm76_vm1, %v52_v5  ;;  %p379_p6 = pnand %p378_p5, %p372_p2 }
 0x104   :  { %v114_v7 = vpop.f32.mrb[0].mxu0 }
 0x105   :  { %v115_v8 = vadd.f32 %v284_v6, %v114_v7  ;;  %v298_v9 = vpop.f32.mrb[1].mxu0 }
 0x106   :  { %v117_v10 = vpop.f32.mrb[2].mxu0 }
 0x107   :  { %315 = vtanh.f32 %v115_v8  ;;  %v118_v11 = vadd.f32 %v284_v6, %v117_v10  ;;  %v299_v12 = vpop.f32.mrb[3].mxu0 }
 0x109   :  { %317 = vtanh.f32 %v118_v11 }
 0x111   :  { %v316_v14 = vpop.eup %315 }
 0x112   :  { %v130_v15 = vmul.f32 %v316_v14, %v288_v13 }
 0x113   :  { %v318_v16 = vpop.eup %317 }
 0x114   :  { %v133_v17 = vsel %vm132_vm2, %v130_v15, 0.0  ;;  %v131_v18 = vmul.f32 %v318_v16, %v288_v13 }
 0x115   :  { %134 = vadd.xlane.f32.xlu0 %v133_v17 }
 0x116   :  { %v136_v19 = vsel %vm132_vm2, %v131_v18, 0.0 }
 0x119   :  { %137 = vadd.xlane.f32.xlu0 %v136_v19 }
 0x1a2   :  { %v135_v23 = vpop.xlane.xlu0 %134 }
 0x1a3   :  { %v146_v26 = vrot.slane %v135_v23, %v145_v24 }
 0x1a6   :  { %v138_v25 = vpop.xlane.xlu0 %137 }
 0x1a7   :  { %v150_v27 = vrot.slane %v138_v25, %v145_v24 }
 0x1a9   :  { %v152_v28 = vsel %vm151_vm3, %v150_v27, %v146_v26 }
 0x1aa   :  { %v155_v29 = vsel %vm154_vm4, %v152_v28, -inf }
 0x1ab   :  { %156 = vmax.xlane.f32.xlu1 %v155_v29 }
 0x238   :  { %v157_v33 = vpop.xlane.xlu1 %156 }
 0x239   :  { %v162_v34 = vrot.slane %v157_v33, %v161_v31  ;;  %v166_v35 = vrot.slane %v157_v33, %v165_v32 }
 0x23b   :  { %v169_v36 = vsub.f32 %v135_v23, %v162_v34  ;;  %v170_v37 = vsub.f32 %v138_v25, %v166_v35 }
 0x23d   :  { %v171_v38 = vmul.f32 1.442695, %v169_v36  ;;  %v173_v39 = vmul.f32 1.442695, %v170_v37 }
 0x23f   :  { %319 = vpow2.f32 %v171_v38 }
 0x240   :  { %321 = vpow2.f32 %v173_v39 }
 0x249   :  { %v320_v40 = vpop.eup %319 }
 0x24a   :  { %v322_v41 = vpop.eup %321  ;;  %178 = vperm.xlu1 %311, %v320_v40  }
 0x24b   :  { %181 = vperm.xlu0 %312, %v322_v41  }
 0x2c9   :  { %v179_v42 = vpop.permute.xlu1 %178 }
 0x2ca   :  { %v182_v43 = vpop.permute.xlu0 %181  ;;  %v186_v44 = vrot.slane %v179_v42, %v145_v24 }
 0x2cb   :  { %v190_v45 = vrot.slane %v182_v43, %v145_v24 }
 0x2cd   :  { %v191_v46 = vsel %vm151_vm3, %v190_v45, %v186_v44 }
 0x2ce   :  { %v193_v47 = vsel %vm154_vm4, %v191_v46, 0.0 }
 0x2cf   :  { %194 = vadd.xlane.f32.xlu1 %v193_v47 }
 0x35c   :  { %v195_v48 = vpop.xlane.xlu1 %194 }
 0x35d   :  { %v200_v49 = vrot.slane %v195_v48, %v161_v31  ;;  %v204_v50 = vrot.slane %v195_v48, %v165_v32 }
 0x35f   :  { %323 = vrcp.f32 %v200_v49 }
 0x360   :  { %325 = vrcp.f32 %v204_v50 }
 0x369   :  { %v324_v51 = vpop.eup %323 }
 0x36a   :  { %v208_v52 = vmul.f32 %v324_v51, %v320_v40  ;;  %v326_v53 = vpop.eup %325 }
 0x36b   :  { %v210_v54 = vmul.f32 %v326_v53, %v322_v41 }
 0x36c   :  { %213 = vperm.xlu0 %312, %v208_v52  }
 0x370   :  { %218 = vperm.xlu0 %312, %v210_v54  }
 0x3eb   :  { %v214_v55 = vpop.permute.xlu0 %213 }
 0x3ec   :  { %v221_v56 = vmul.f32 %v214_v55, %v488_v3  ;;  %v246_v60 = vrot.slane %v214_v55, %v145_v24 }
 0x3ee   :  { %v223_v57 = vsel %vm76_vm1, %v221_v56, 0.0 }
 0x3ef   :  { %v224_v58 = vrot.slane %v223_v57, 4  ;;  %v219_v59 = vpop.permute.xlu0 %218 }
 0x3f0   :  { %v222_v61 = vmul.f32 %v219_v59, %v490_v4  ;;  %v250_v62 = vrot.slane %v219_v59, %v145_v24 }
 0x3f1   :  { %v225_v63 = vadd.f32 %v224_v58, %v223_v57 }
 0x3f2   :  { %v230_v0 = vsel %vm76_vm1, %v222_v61, 0.0  ;;  %v251_v1 = vsel %vm151_vm3, %v250_v62, %v246_v60 }
 0x3f3   :  { %v226_v2 = vrot.slane %v225_v63, 2  ;;  %v231_v5 = vrot.slane %v230_v0, 4  ;;  %253 = vst.msk [vmem:[#allocation8] sm:$0x3] %vm154_vm4, %v251_v1 }
 0x3f4   :  { %382 = shalt.err (!%p379_p6)
}
 0x3f5   :  { %s383_s26 = scalar_lea.hbm %s541_s5, 32 }
 0x3f6   :  { %p384_p7 = scmp.ne.s32.totalorder %s541_s5, %s383_s26  ;;  %p387_p8 = scmp.lt.u32.totalorder %s383_s26, %s541_s5 }
 0x3f8   :  { %p389_p9 = pnand %p387_p8, %p384_p7 }
 0x3fa   :  { %392 = shalt.err (!%p389_p9)
}
 0x3fb   :  { %273 = dma.vmem_to_hbm [thread:$0]  %s271_s3, 32, %s541_s5, [#allocation9]   ;;  %v227_v3 = vadd.f32 %v226_v2, %v225_v63  ;;  %v232_v4 = vadd.f32 %v231_v5, %v230_v0  ;;  %vm241_vm5 = vcmask 254976  }
 0x3fc   :  { %s433_s8 = smov [#allocation7]  }
 0x3fd   :  { %v233_v6 = vrot.slane %v232_v4, 2  ;;  %v228_v7 = vrot.slane %v227_v3, 1  ;;  %s260_s9 = sshll.u32 %s433_s8, 4  ;;  %s261_s9 = int_to_ptr.vmem [resolvable:$true] %s260_s9 }
 0x3fe   :  { %s393_s10 = scalar_lea.vmem %s261_s9, 32  ;;  %p398_p11 = scmp.lt.s32.totalorder %s261_s9, %s261_s9 }
 0x3ff   :  { %v234_v8 = vadd.f32 %v233_v6, %v232_v4  ;;  %v229_v11 = vadd.f32 %v228_v7, %v227_v3  ;;  %p394_p10 = scmp.ne.s32.totalorder %s261_s9, %s393_s10  ;;  %p399_p12 = scmp.lt.s32.totalorder %s393_s10, %s393_s10 }
 0x401   :  { %v235_v9 = vrot.slane %v234_v8, 1  ;;  %p400_p13 = por %p399_p12, %p398_p11 }
 0x403   :  { %v236_v10 = vadd.f32 %v235_v9, %v234_v8  ;;  %p401_p0 = pnand %p400_p13, %p394_p10 }
 0x405   :  { %v239_v12 = vsel %vm151_vm3, %v236_v10, %v229_v11 }
 0x406   :  { %242 = vst.msk [vmem:[#allocation7] sm:$0x3] %vm241_vm5, %v239_v12 }
 0x407   :  { %404 = shalt.err (!%p401_p0)
}
 0x408   :  { %s405_s12 = scalar_lea.hbm %s540_s4, 32 }
 0x409   :  { %p406_p1 = scmp.ne.s32.totalorder %s540_s4, %s405_s12  ;;  %p409_p2 = scmp.lt.u32.totalorder %s405_s12, %s540_s4 }
 0x40b   :  { %p411_p3 = pnand %p409_p2, %p406_p1 }
 0x40d   :  { %414 = shalt.err (!%p411_p3)
}
 0x40e   :  { %263 = dma.vmem_to_hbm [thread:$0]  %s261_s9, 32, %s540_s4, [#allocation4]  }
 0x40f   :  { %419 = dma.done.wait [#allocation4], 32  }
 0x410   :  { %420 = vsyncadd [#allocation4], 4294967264 }
 0x411   :  { %421 = dma.done.wait [#allocation9], 32  }
 0x412   :  { %422 = vsyncadd [#allocation9], 4294967264 }
 0x413   :  { %280 = vsyncpa [#allocation3], 1 }
 0x414   :  { %281 = vsyncpa [#allocation6], 1 }
 0x415   :  { %282 = vsyncpa [#allocation4], 1 }
 0x416   :  { %283 = vsyncpa [#allocation9], 1 }

</bundles_post_ra>
